<compile_context>
chip_gen: v7x
topology: tpu7x:2x2x1
jax: 0.10.0
libtpu: 0.0.40
codegen_flags: <defaults>
</compile_context>

<pallas_src>
import jax
import jax.numpy as jnp
from jax.experimental import pallas as pl
from jax.experimental.pallas import tpu as pltpu


def _se_kernel(x_ref, w1_ref, b1_ref, w2_ref, b2_ref, o_ref):
    # ---- squeeze: per-(n, c) global average pool over the HW lane axis ----
    # (read #1 of the block; consumed immediately by the streaming reduce)
    s = jnp.mean(x_ref[...].astype(jnp.float32), axis=2)              # (TN, C)

    # ---- excitation MLP (1x1 convs on a 1x1 map == dense), batched over TN --
    h = jnp.einsum("nc,rc->nr", s, w1_ref[...],
                   preferred_element_type=jnp.float32) + b1_ref[...]  # (TN, Cr)
    h = jnp.maximum(h, 0.0)                                           # ReLU
    g = jnp.einsum("nr,cr->nc", h, w2_ref[...],
                   preferred_element_type=jnp.float32) + b2_ref[...]  # (TN, C)
    g = jax.nn.sigmoid(g)                                             # (TN, C)

    # ---- scale: broadcast the per-(n, c) gate over the HW lanes ----
    # (read #2 of the block; avoids keeping the whole slab live across the MLP)
    o_ref[...] = (x_ref[...] * g[:, :, None]).astype(o_ref.dtype)


def _vmem_capacity_bytes():
    try:
        info = pltpu.get_tpu_info()
        for attr in ("vmem_capacity_bytes", "vmem_bytes"):
            val = getattr(info, attr, None)
            if val:
                return int(val)
    except Exception:
        pass
    return 64 * 1024 * 1024  # conservative floor (v7x physical VMEM)


def se_module(x_nchw, w1, b1, w2, b2):
    """SE forward.

    x_nchw: (N, C, H, W), float32 or bfloat16 (output matches input dtype).
    w1: (Cr, C)  -- conv1.weight[:, :, 0, 0];  b1: (Cr,)
    w2: (C, Cr)  -- conv2.weight[:, :, 0, 0];  b2: (C,)
    """
    N, C, H, W = x_nchw.shape
    Cr = w1.shape[0]
    HW = H * W

    # NCHW -> (N, C, HW): contiguous, zero-cost reshape (no transpose).
    x = x_nchw.reshape(N, C, HW)
    b1r = b1.reshape(1, Cr).astype(jnp.float32)
    b2r = b2.reshape(1, C).astype(jnp.float32)
    w1f = w1.astype(jnp.float32)
    w2f = w2.astype(jnp.float32)

    # ---- block sizing: fold TN batch elements into each grid step ----------
    itemsize = jnp.dtype(x.dtype).itemsize
    per_elem_bytes = C * HW * itemsize
    vmem_cap = _vmem_capacity_bytes()
    # x-in and out are each double-buffered -> 4 live stream buffers; spend at
    # most ~half of physical VMEM on them (headroom for weights / temporaries).
    stream_budget = min(vmem_cap // 2, 48 * 1024 * 1024)
    tn_vmem = max(1, stream_budget // (4 * per_elem_bytes))
    tn_target = max(1, (4 * 1024 * 1024) // per_elem_bytes)   # ~4 MiB x-blocks
    tn_two_steps = max(1, pl.cdiv(N, 2))   # keep >= 2 grid steps (v7x: 2 TCs)
    TN = int(max(1, min(tn_vmem, tn_target, tn_two_steps, N)))
    grid_n = pl.cdiv(N, TN)

    # Raise the scoped VMEM limit (defaults: 16 MiB v5e / 32 MiB v6e & v7x).
    vmem_limit = int(min(int(vmem_cap * 0.75), 100 * 1024 * 1024))

    cost = pl.CostEstimate(
        flops=int(2 * N * C * HW + 4 * N * C * Cr),   # mean + scale + tiny MLP
        transcendentals=int(N * C),                   # sigmoid exp
        bytes_accessed=int(2 * N * C * HW * itemsize
                           + (2 * C * Cr + C + Cr) * 4),
    )

    out = pl.pallas_call(
        _se_kernel,
        out_shape=jax.ShapeDtypeStruct((N, C, HW), x.dtype),
        grid_spec=pltpu.PrefetchScalarGridSpec(
            num_scalar_prefetch=0,
            grid=(grid_n,),
            in_specs=[
                pl.BlockSpec((TN, C, HW), lambda n: (n, 0, 0)),
                pl.BlockSpec((Cr, C), lambda n: (0, 0)),
                pl.BlockSpec((1, Cr), lambda n: (0, 0)),
                pl.BlockSpec((C, Cr), lambda n: (0, 0)),
                pl.BlockSpec((1, C), lambda n: (0, 0)),
            ],
            out_specs=pl.BlockSpec((TN, C, HW), lambda n: (n, 0, 0)),
        ),
        compiler_params=pltpu.CompilerParams(
            dimension_semantics=("parallel",),
            vmem_limit_bytes=vmem_limit,
        ),
        cost_estimate=cost,
    )(x, w1f, b1r, w2f, b2r)

    # (N, C, HW) -> NCHW: free reshape.
    return out.reshape(N, C, H, W)


def _reference(x_nchw, w1, b1, w2, b2):
    # pure-JAX reference matching the PyTorch module (f32 math)
    xf = x_nchw.astype(jnp.float32)
    s = jnp.mean(xf, axis=(2, 3))                           # (N, C)
    h = jnp.maximum(s @ w1.T + b1, 0.0)                     # (N, Cr)
    g = jax.nn.sigmoid(h @ w2.T + b2)                       # (N, C)
    return xf * g[:, :, None, None]


if __name__ == "__main__":
    # SEModule(in_channels=32, reduction=16); H=W=16 -> HW=256 (lane-dense).
    N, C, H, W = 2, 32, 16, 16
    reduction = 16
    Cr = C // reduction

    key = jax.random.PRNGKey(0)
    kx, k1, k2, k3, k4 = jax.random.split(key, 5)

    x = jax.random.normal(kx, (N, C, H, W), dtype=jnp.float32)

    # PyTorch-native parameter shapes (1x1 conv weights squeezed to dense):
    w1 = jax.random.normal(k1, (Cr, C), dtype=jnp.float32) * 0.1   # conv1 weight
    b1 = jax.random.normal(k2, (Cr,), dtype=jnp.float32) * 0.1     # conv1 bias
    w2 = jax.random.normal(k3, (C, Cr), dtype=jnp.float32) * 0.1   # conv2 weight
    b2 = jax.random.normal(k4, (C,), dtype=jnp.float32) * 0.1      # conv2 bias

    # f32 streaming path
    out = jax.block_until_ready(se_module(x, w1, b1, w2, b2))
    ref = _reference(x, w1, b1, w2, b2)
    assert out.shape == (N, C, H, W)
    assert out.dtype == jnp.float32
    assert jnp.allclose(out, ref, atol=1e-5, rtol=1e-5), "f32 mismatch vs reference"

    # bf16 streaming variant (params and internal math stay f32)
    x_bf = x.astype(jnp.bfloat16)
    out_bf = jax.block_until_ready(se_module(x_bf, w1, b1, w2, b2))
    ref_bf = _reference(x_bf, w1, b1, w2, b2)
    assert out_bf.dtype == jnp.bfloat16
    assert jnp.allclose(out_bf.astype(jnp.float32), ref_bf, atol=2e-2, rtol=2e-2), \
        "bf16 mismatch vs reference"

    print("KERNEL_OK")
</pallas_src>

<mosaic_0001>
module attributes {stable_mosaic.version = 11 : i64} {
  func.func @_se_kernel(%arg0: i32, %arg1: memref<1x32x256xf32, #tpu.memory_space<vmem>>, %arg2: memref<2x32xf32, #tpu.memory_space<vmem>>, %arg3: memref<1x2xf32, #tpu.memory_space<vmem>>, %arg4: memref<32x2xf32, #tpu.memory_space<vmem>>, %arg5: memref<1x32xf32, #tpu.memory_space<vmem>>, %arg6: memref<1x32x256xf32, #tpu.memory_space<vmem>>) attributes {dimension_semantics = [#tpu.dimension_semantics<parallel>], iteration_bounds = array<i64: 2>, scalar_prefetch = 0 : i64, scratch_operands = 0 : i64, tpu.core_type = #tpu.core_type<tc>, window_params = [{transform_indices = @transform_0, window_bounds = array<i64: 1, 32, 256>}, {pipeline_mode = #tpu.pipeline_mode<synchronous>, transform_indices = @transform_1, window_bounds = array<i64: 2, 32>}, {pipeline_mode = #tpu.pipeline_mode<synchronous>, transform_indices = @transform_2, window_bounds = array<i64: 1, 2>}, {pipeline_mode = #tpu.pipeline_mode<synchronous>, transform_indices = @transform_3, window_bounds = array<i64: 32, 2>}, {pipeline_mode = #tpu.pipeline_mode<synchronous>, transform_indices = @transform_4, window_bounds = array<i64: 1, 32>}, {transform_indices = @transform_5, window_bounds = array<i64: 1, 32, 256>}]} {
    %c0 = arith.constant 0 : index
    %c0_0 = arith.constant 0 : index
    %c0_1 = arith.constant 0 : index
    %0 = vector.load %arg1[%c0, %c0_0, %c0_1] : memref<1x32x256xf32, #tpu.memory_space<vmem>>, vector<1x32x256xf32>
    %cst = arith.constant dense<0.000000e+00> : vector<1x32xf32>
    %1 = vector.multi_reduction <add>, %0, %cst [2] : vector<1x32x256xf32> to vector<1x32xf32>
    %cst_2 = arith.constant 2.560000e+02 : f32
    %2 = vector.broadcast %cst_2 : f32 to vector<1x32xf32>
    %3 = arith.divf %1, %2 : vector<1x32xf32>
    %c0_3 = arith.constant 0 : index
    %c0_4 = arith.constant 0 : index
    %4 = vector.load %arg2[%c0_3, %c0_4] : memref<2x32xf32, #tpu.memory_space<vmem>>, vector<2x32xf32>
    "tpu.trace_start"() <{level = 10 : i32, message = "nc,rc->nr"}> : () -> ()
    %cst_5 = arith.constant dense<0.000000e+00> : vector<1x2xf32>
    %5 = tpu.matmul %3, %4, %cst_5 {dimension_numbers = #tpu.dot_dimension_numbers<[1], [1], [0], [0], [0, 0, 1, 0], [], []>} : vector<1x32xf32>, vector<2x32xf32>, vector<1x2xf32> -> vector<1x2xf32>
    "tpu.trace_stop"() : () -> ()
    %c0_6 = arith.constant 0 : index
    %c0_7 = arith.constant 0 : index
    %6 = vector.load %arg3[%c0_6, %c0_7] : memref<1x2xf32, #tpu.memory_space<vmem>>, vector<1x2xf32>
    %7 = arith.addf %5, %6 : vector<1x2xf32>
    %cst_8 = arith.constant 0.000000e+00 : f32
    %8 = vector.broadcast %cst_8 : f32 to vector<1x2xf32>
    %9 = arith.maximumf %7, %8 : vector<1x2xf32>
    %c0_9 = arith.constant 0 : index
    %c0_10 = arith.constant 0 : index
    %10 = vector.load %arg4[%c0_9, %c0_10] : memref<32x2xf32, #tpu.memory_space<vmem>>, vector<32x2xf32>
    "tpu.trace_start"() <{level = 10 : i32, message = "nr,cr->nc"}> : () -> ()
    %cst_11 = arith.constant dense<0.000000e+00> : vector<1x32xf32>
    %11 = tpu.matmul %9, %10, %cst_11 {dimension_numbers = #tpu.dot_dimension_numbers<[1], [1], [0], [0], [0, 0, 1, 0], [], []>} : vector<1x2xf32>, vector<32x2xf32>, vector<1x32xf32> -> vector<1x32xf32>
    "tpu.trace_stop"() : () -> ()
    %c0_12 = arith.constant 0 : index
    %c0_13 = arith.constant 0 : index
    %12 = vector.load %arg5[%c0_12, %c0_13] : memref<1x32xf32, #tpu.memory_space<vmem>>, vector<1x32xf32>
    %13 = arith.addf %11, %12 : vector<1x32xf32>
    %14 = arith.negf %13 : vector<1x32xf32>
    %15 = math.exp %14 : vector<1x32xf32>
    %cst_14 = arith.constant 1.000000e+00 : f32
    %16 = vector.broadcast %cst_14 : f32 to vector<1x32xf32>
    %17 = arith.addf %16, %15 : vector<1x32xf32>
    %18 = arith.divf %16, %17 : vector<1x32xf32>
    %c0_15 = arith.constant 0 : index
    %c0_16 = arith.constant 0 : index
    %c0_17 = arith.constant 0 : index
    %19 = vector.load %arg1[%c0_15, %c0_16, %c0_17] : memref<1x32x256xf32, #tpu.memory_space<vmem>>, vector<1x32x256xf32>
    %20 = vector.shape_cast %18 : vector<1x32xf32> to vector<1x32x1xf32>
    %21 = vector.broadcast %20 : vector<1x32x1xf32> to vector<1x32x256xf32>
    %22 = arith.mulf %19, %21 : vector<1x32x256xf32>
    %c0_18 = arith.constant 0 : index
    %c0_19 = arith.constant 0 : index
    %c0_20 = arith.constant 0 : index
    %23 = vector.load %arg6[%c0_18, %c0_19, %c0_20] : memref<1x32x256xf32, #tpu.memory_space<vmem>>, vector<1x32x256xf32>
    tpu.vector_store %arg6[%c0_18, %c0_19, %c0_20], %22 {strides = array<i32>} : memref<1x32x256xf32, #tpu.memory_space<vmem>>, vector<1x32x256xf32>,
    return
  }
  func.func @transform_0(%arg0: i32) -> (i32, i32, i32) {
    %c0_i32 = arith.constant 0 : i32
    %c0_i32_0 = arith.constant 0 : i32
    %c0_i32_1 = arith.constant 0 : i32
    return %arg0, %c0_i32, %c0_i32_0 : i32, i32, i32
  }
  func.func @transform_1(%arg0: i32) -> (i32, i32) {
    %c0_i32 = arith.constant 0 : i32
    %c0_i32_0 = arith.constant 0 : i32
    %c0_i32_1 = arith.constant 0 : i32
    return %c0_i32, %c0_i32_0 : i32, i32
  }
  func.func @transform_2(%arg0: i32) -> (i32, i32) {
    %c0_i32 = arith.constant 0 : i32
    %c0_i32_0 = arith.constant 0 : i32
    %c0_i32_1 = arith.constant 0 : i32
    return %c0_i32, %c0_i32_0 : i32, i32
  }
  func.func @transform_3(%arg0: i32) -> (i32, i32) {
    %c0_i32 = arith.constant 0 : i32
    %c0_i32_0 = arith.constant 0 : i32
    %c0_i32_1 = arith.constant 0 : i32
    return %c0_i32, %c0_i32_0 : i32, i32
  }
  func.func @transform_4(%arg0: i32) -> (i32, i32) {
    %c0_i32 = arith.constant 0 : i32
    %c0_i32_0 = arith.constant 0 : i32
    %c0_i32_1 = arith.constant 0 : i32
    return %c0_i32, %c0_i32_0 : i32, i32
  }
  func.func @transform_5(%arg0: i32) -> (i32, i32, i32) {
    %c0_i32 = arith.constant 0 : i32
    %c0_i32_0 = arith.constant 0 : i32
    %c0_i32_1 = arith.constant 0 : i32
    return %arg0, %c0_i32, %c0_i32_0 : i32, i32, i32
  }
}

</mosaic_0001>

<bundles_post_ra>
// kernel: tpu_custom_call.1
= control target key start
LH: loop header
LB: loop body
LE: loop exit
PB: predicated region body
PF: predicated region fallthrough
CT: control target
= control target key end

     0   :  { %10 = vsyncpa [#allocation3], 0  ;;  %s1078_s0 = inlined_call_operand.hbm [shape: f32[2,32,256], index: 0, kind: input, shape index: {}]   ;;  %s1079_s1 = inlined_call_operand.vmem [shape: f32[2,32], index: 1, kind: input, shape index: {}]   ;;  %s1080_s2 = inlined_call_operand.vmem [shape: f32[1,2], index: 2, kind: input, shape index: {}]   ;;  %s1081_s3 = inlined_call_operand.vmem [shape: f32[32,2], index: 3, kind: input, shape index: {}]   ;;  %s1082_s4 = inlined_call_operand.vmem [shape: f32[1,32], index: 4, kind: input, shape index: {}]   ;;  %s1083_s5 = inlined_call_operand.hbm [shape: f32[2,32,256], index: 5, kind: output, shape index: {}]  }
   0x1   :  { %12 = vsyncpa [#allocation3 + $0x1], 0 }
   0x2   :  { %13 = vsyncpa [#allocation4], 0 }
   0x3   :  { %15 = vsyncpa [#allocation4 + $0x1], 0  ;;  %s854_s18 = smov 0   ;;  %s856_s19 = smov 0  }
   0x4   :  { %s858_s20 = smov 0   ;;  %s860_s21 = smov 0  }
   0x5 LB: > { %s875_s22 = sadd.s32 4294967295, %s813_s21   ;;  %s605_s23 = sadd.s32 4294967294, %s813_s21   ;;  %s813_s21 = sphi %s860_s21, %s1096_s21   ;;  %s809_s20 = sphi %s858_s20, %s1095_s20   ;;  %s805_s19 = sphi %s856_s19, %s1094_s19   ;;  %s801_s18 = sphi %s854_s18, %s1093_s18  }
   0x6   : > { %s879_s24 = sadd.s32 1, %s813_s21   ;;  %s28_s25 = sadd.s32 1, %s809_s20 }
   0x7   : > { %s25_s26 = ssub.s32 %s813_s21, %s879_s24  ;;  %p35_p0 = scmp.ne.s32.totalorder %s809_s20, %s805_s19 }
   0x8   : > { %p26_p1 = scmp.eq.s32.totalorder %s25_s26, 0  ;;  %p36_p2 = scmp.eq.s32.totalorder %s813_s21, 0 }
   0x9   : > { %p41_p3 = scmp.ne.s32.totalorder %s805_s19, %s801_s18  ;;  %p42_p4 = scmp.eq.s32.totalorder %s875_s22, 0 }
   0xa   : > { %s891_s27 = scalar_select %p26_p1, %s809_s20, %s28_s25  }
   0xb   : > { %p893_p5 = por %p36_p2, %p35_p0  ;;  %p897_p6 = por %p42_p4, %p41_p3 }
   0xc   : > { %p149_p7 = scmp.eq.s32.totalorder %s875_s22, 1  ;;  %p155_p8 = scmp.eq.s32.totalorder %s605_s23, 1 }
   0xd   : > { %p672_p10 = scmp.lt.s32.totalorder %s813_s21, 2  ;;  %s187_s7 = sand.u32 1, %s809_s20  }
   0xe   : > { %p904_p11 = por %p149_p7, %p35_p0  ;;  %p908_p12 = por %p155_p8, %p41_p3 }
   0xf   : > { %s627_s8 = sshll.u32 %s813_s21, 10  ;;  %s608_s9 = sshll.u32 %s187_s7, 6 }
  0x10   : > { %s1087_s30 = scalar_select %p904_p11, 1, 0 }
  0x11   : > { %s1088_s6 = scalar_select %p908_p12, 1, 0 }
  0x12   : > { %s917_s12 = scalar_lea.hbm %s1078_s0, %s627_s8  ;;  %s191_s13 = scalar_lea.vmem [#allocation2], %s608_s9 }
  0x13   : > { %s198_s14 = sshll.u32 %s191_s13, 4  ;;  %p921_p13 = pnand %p672_p10, %p893_p5  ;;  %s925_s14 = int_to_ptr.vmem [resolvable:$true] %s198_s14 }
  0x14   : > { %s927_s16 = scalar_lea.sflag [#allocation3], %s187_s7  ;;  %s717_s17 = scalar_lea.hbm %s917_s12, 1024 }
  0x15   : > { %p718_p0 = scmp.ne.s32.totalorder %s917_s12, %s717_s17  ;;  %p719_p1 = pneg %p921_p13 }
  0x16   : > { %s722_s26 = scalar_lea.hbm %s1078_s0, 2048  ;;  %p723_p4 = scmp.lt.u32.totalorder %s917_s12, %s1078_s0 }
  0x17   : > { %p720_p2 = pnand %p719_p1, %p718_p0  ;;  %p724_p5 = scmp.lt.u32.totalorder %s722_s26, %s717_s17 }
  0x18   : > { %p726_p8 = scmp.lt.u32.totalorder %s717_s17, %s917_s12 }
  0x19   : > { %p721_p3 = pneg %p720_p2  ;;  %p725_p7 = por %p724_p5, %p723_p4 }
  0x1b   : > { %p727_p10 = por %p726_p8, %p725_p7 }
  0x1d   : > { %p728_p9 = pnand %p727_p10, %p721_p3 }
  0x1f   : > { %731 = shalt.err (!%p728_p9)
}
  0x20   : > { %s732_s7 = scalar_lea.vmem %s925_s14, 1024  ;;  %s815_s9 = smov [#allocation2]  }
  0x21   : > { %p733_p0 = scmp.ne.s32.totalorder %s925_s14, %s732_s7  ;;  %s737_s10 = sshll.u32 %s815_s9, 4  ;;  %s738_s10 = int_to_ptr.vmem [resolvable:$false] %s737_s10 }
  0x22   : > { %s739_s11 = scalar_lea.vmem %s738_s10, 2048  ;;  %p740_p11 = scmp.lt.s32.totalorder %s925_s14, %s738_s10 }
  0x23   : > { %p735_p2 = pnand %p733_p0, %p719_p1  ;;  %p741_p4 = scmp.lt.s32.totalorder %s739_s11, %s732_s7 }
  0x25   : > { %p736_p12 = pneg %p735_p2  ;;  %p742_p5 = por %p741_p4, %p740_p11 }
  0x27   : > { %p743_p7 = pnand %p742_p5, %p736_p12 }
  0x29   : > { %746 = shalt.err (!%p743_p7)
}
  0x2a   : > { %s816_s13 = smov 256   ;;  %s817_s17 = smov 16  }
  0x2b   : > { %667 = dma.hbm_to_vmem [thread:$0]  (!%p921_p13), %s917_s12, 1024, %s925_s14, %s927_s16, %s816_s13, %s816_s13, %s817_s17  }
  0x2c   : > { %p611_p9 = scmp.ge.s32.totalorder %s813_s21, 1  ;;  %p206_p1 = scmp.lt.s32.totalorder %s813_s21, 3 }
  0x2e   : > { %p207_p3 = pnand %p611_p9, %p206_p1 }
  0x2f   : > { %s958_s23 = sand.u32 (!%p207_p3), 1, %s805_s19  }
  0x30   : > { %210 = sbr.rel (%p207_p3) target bundleno = 810 (0x32a), region = 40  ;;  %s612_s25 = sshll.u32 (!%p207_p3), %s958_s23, 6 }
  0x31   : > { %s213_s26 = scalar_lea.sflag (!%p207_p3), [#allocation3], %s958_s23  ;;  %s216_s28 = scalar_lea.vmem (!%p207_p3), [#allocation2], %s612_s25 }
  0x37   : > { %792 = dma.done.wait (%p897_p6), %s213_s26, 1024  }
  0x38   : > { %794 = vsyncadd (%p897_p6), %s213_s26, 4294966272  ;;  %v968_v0 = vld [vmem:[%s216_s28] sm:$0xff]  ;;  %v970_v1 = vld [vmem:[%s216_s28 + $0x8] sm:$0xff]  ;;  %v818_v12 = vmov 0.0   ;;  %vm301_vm0 = vcmask 261120   ;;  %vm819_vm1 = vmmov 0   ;;  %v274_v21 = vlaneseq }
  0x39   : > { %v972_v2 = vld [vmem:[%s216_s28 + $0x20] sm:$0xff]  ;;  %v251_v3 = vadd.f32 %v970_v1, %v968_v0  ;;  %v976_v4 = vld [vmem:[%s216_s28 + $0x28] sm:$0xff]  ;;  %v978_v5 = vld [vmem:[%s216_s28 + $0x10] sm:$0xff]  ;;  %636 = vmatprep.subr.mxu0 %v818_v12  ;;  %638 = vmatprep.mubr.msk.f32.mxu0 %vm819_vm1, %v818_v12  ;;  %vm383_vm2 = vcmask 15360   ;;  %v820_v16 = vmov 0.0|0.0   ;;  %vm285_vm4 = vcmask 130112  }
  0x3a   : > { %v980_v6 = vld [vmem:[%s216_s28 + $0x18] sm:$0xff]  ;;  %v257_v7 = vadd.f32 %v976_v4, %v972_v2  ;;  %v984_v8 = vld [vmem:[%s216_s28 + $0x30] sm:$0xff]  ;;  %v268_v13 = vld [vmem:[%s1079_s1] sm:$0x3]  ;;  %649 = vmatprep.mubr.msk.f32.mxu1 %vm819_vm1, %v818_v12  ;;  %652 = vmatprep.subr.bf16.mxu1 %v820_v16  ;;  %v275_v22 = vand.u32 127, %v274_v21  ;;  %v277_v23 = vshrl.u32 %v274_v21, 7 }
  0x3b   : > { %v986_v9 = vld [vmem:[%s216_s28 + $0x38] sm:$0xff]  ;;  %252 = vadd.xlane.f32.xlu0 %v251_v3  ;;  %v254_v10 = vadd.f32 %v980_v6, %v978_v5  ;;  %637 = vmatpush3.xpose.msk.msra.mxu0 %vm301_vm0, %v268_v13  ;;  %v378_v14 = vld [vmem:[%s1081_s3] sm:$0xff]  ;;  %v379_v15 = vld [vmem:[%s1081_s3 + $0x8] sm:$0xff]  ;;  %vm292_vm5 = vcmask 195712   ;;  %vm299_vm6 = vcmask 261312   ;;  %s242_s29 = scalar_lea.vmem [#allocation5], %s612_s25 }
  0x3c   : > { %258 = vadd.xlane.f32.xlu1 %v257_v7  ;;  %v260_v11 = vadd.f32 %v986_v9, %v984_v8  ;;  %v653_v17 = vpack.c.bf16 %v379_v15, %v378_v14  ;;  %vm654_vm3 = vmpackc.low %vm383_vm2, %vm383_vm2  ;;  %v380_v18 = vld [vmem:[%s1081_s3 + $0x10] sm:$0xff]  ;;  %v381_v19 = vld [vmem:[%s1081_s3 + $0x18] sm:$0xff]  ;;  %v280_v24 = vadd.s32 4294967288, %v275_v22  ;;  %v287_v26 = vadd.s32 4294967280, %v275_v22  ;;  %s532_s12 = sshll.u32 %s242_s29, 4  ;;  %s628_s14 = sshll.u32 %s875_s22, 10  ;;  %s1027_s12 = int_to_ptr.vmem [resolvable:$true] %s532_s12 }
  0x3d   : > { %v657_v20 = vpack.c.bf16 %v381_v19, %v380_v18  ;;  %v294_v27 = vadd.s32 4294967272, %v275_v22  ;;  %v278_v29 = vsub.s32 %v275_v22, %v277_v23  ;;  %v269_v46 = vld [vmem:[%s1080_s2] sm:$0x1]  ;;  %v485_v58 = vsub.s32 0, %v277_v23  ;;  %s1032_s16 = scalar_lea.hbm %s1083_s5, %s628_s14  ;;  %s519_s22 = scalar_lea.sflag [#allocation4], %s958_s23 }
  0x3e   : > { %655 = vmatpush3.bf16.xpose.msk.msra.mxu1 %vm654_vm3, %v653_v17  ;;  %v283_v31 = vsub.s32 %v280_v24, %v277_v23  ;;  %v290_v32 = vsub.s32 %v287_v26, %v277_v23  ;;  %v382_v51 = vld [vmem:[%s1082_s4] sm:$0x1]  ;;  %s747_s8 = scalar_lea.vmem %s1027_s12, 1024  ;;  %p1090_p11 = scmp.ne.s32.totalorder %s1087_s30, 0 }
  0x3f   : > { %255 = vadd.xlane.f32.xlu0 %v254_v10  ;;  %656 = vmatprep.subr.bf16.mxu1 %v820_v16  ;;  %v297_v35 = vsub.s32 %v294_v27, %v277_v23  ;;  %p748_p6 = scmp.ne.s32.totalorder %s1027_s12, %s747_s8  ;;  %s821_s7 = smov [#allocation5]  }
  0x40   : > { %261 = vadd.xlane.f32.xlu1 %v260_v11  ;;  %s751_s9 = sshll.u32 %s821_s7, 4  ;;  %s752_s9 = int_to_ptr.vmem [resolvable:$false] %s751_s9 }
  0x41   : > { %p749_p12 = pnand %p748_p6, %p1090_p11  ;;  %s753_s10 = scalar_lea.vmem %s752_s9, 2048 }
  0x42   : > { %p754_p8 = scmp.lt.s32.totalorder %s1027_s12, %s752_s9  ;;  %p755_p10 = scmp.lt.s32.totalorder %s753_s10, %s747_s8 }
  0x43   : > { %p750_p13 = pneg %p749_p12 }
  0x44   : > { %p756_p0 = por %p755_p10, %p754_p8 }
  0x46   : > { %659 = vmatpush3.bf16.xpose.msk.msra.mxu1 %vm654_vm3, %v657_v20  ;;  %p757_p2 = pnand %p756_p0, %p750_p13 }
  0xc8   : > { %v253_v25 = vpop.xlane.xlu0 %252 }
  0xc9   : > { %v259_v28 = vpop.xlane.xlu1 %258  ;;  %v264_v30 = vmul.f32 0.00390625, %v253_v25 }
  0xca   : > { %v266_v33 = vmul.f32 0.00390625, %v259_v28 }
  0xcb   : > { %v279_v39 = vrot.slane %v264_v30, %v278_v29 }
  0xcc   : > { %v256_v34 = vpop.xlane.xlu0 %255  ;;  %v291_v41 = vrot.slane %v266_v33, %v290_v32 }
  0xcd   : > { %v265_v36 = vmul.f32 0.00390625, %v256_v34  ;;  %v262_v37 = vpop.xlane.xlu1 %261 }
  0xce   : > { %v267_v38 = vmul.f32 0.00390625, %v262_v37 }
  0xcf   : > { %v284_v40 = vrot.slane %v265_v36, %v283_v31 }
  0xd0   : > { %v298_v42 = vrot.slane %v267_v38, %v297_v35 }
  0xd1   : > { %v286_v43 = vsel %vm285_vm4, %v284_v40, %v279_v39 }
  0xd2   : > { %v293_v44 = vsel %vm292_vm5, %v291_v41, %v286_v43 }
  0xd3   : > { %v300_v45 = vsel %vm299_vm6, %v298_v42, %v293_v44 }
  0xd4   : > { %639 = vmatmul.mubr.msk.f32.vlgmr.msra.gmra.mrb[0].mxu0 %vm301_vm0, %v300_v45 }
 0x1a7   : > { %v373_v47 = vpop.f32.mrb[0].mxu0 }
 0x1a8   : > { %v374_v48 = vadd.f32 %v373_v47, %v269_v46  ;;  %v640_v49 = vpop.f32.mrb[1].mxu0 }
 0x1aa   : > { %v377_v50 = vmax.f32 %v374_v48, 0.0 }
 0x1ac   : > { %650 = vmatmul.mubr.msk.f32.vlgmr.msra.gmra.mrb[0].mxu1 %vm383_vm2, %v377_v50 }
 0x27f   : > { %v465_v52 = vpop.f32.mrb[0].mxu1 }
 0x280   : > { %v466_v53 = vadd.f32 %v465_v52, %v382_v51  ;;  %v651_v54 = vpop.f32.mrb[1].mxu1 }
 0x282   : > { %v621_v55 = vmul.f32 -1.442695, %v466_v53 }
 0x284   : > { %713 = vpow2.f32 %v621_v55 }
 0x28e   : > { %v714_v56 = vpop.eup %713 }
 0x28f   : > { %v472_v57 = vadd.f32 1.0, %v714_v56 }
 0x291   : > { %715 = vrcp.f32 %v472_v57 }
 0x29b   : > { %v716_v59 = vpop.eup %715 }
 0x29c   : > { %v486_v60 = vrot.slane %v716_v59, %v485_v58 }
 0x29e   : > { %492 = vbcast.lane.b32.xlu1 %v486_v60, 264  ;;  %488 = vbcast.lane.b32.xlu0 %v486_v60, 256 }
 0x2a2   : > { %496 = vbcast.lane.b32.xlu1 %v486_v60, 272 }
 0x2a6   : > { %500 = vbcast.lane.b32.xlu1 %v486_v60, 280 }
 0x310   : > { %v493_v61 = vpop.permute.xlu1 %492  ;;  %v489_v62 = vpop.permute.xlu0 %488 }
 0x311   : > { %v504_v63 = vmul.f32 %v493_v61, %v978_v5  ;;  %v505_v3 = vmul.f32 %v493_v61, %v980_v6  ;;  %v502_v7 = vmul.f32 %v489_v62, %v968_v0  ;;  %v503_v10 = vmul.f32 %v489_v62, %v970_v1 }
 0x313   : > { %512 = vst [vmem:[%s242_s29 + $0x10] sm:$0xff] %v504_v63  ;;  %513 = vst [vmem:[%s242_s29 + $0x18] sm:$0xff] %v505_v3 }
 0x314   : > { %510 = vst [vmem:[%s242_s29] sm:$0xff] %v502_v7  ;;  %511 = vst [vmem:[%s242_s29 + $0x8] sm:$0xff] %v503_v10  ;;  %v497_v11 = vpop.permute.xlu1 %496 }
 0x315   : > { %v506_v12 = vmul.f32 %v497_v11, %v972_v2  ;;  %v507_v5 = vmul.f32 %v497_v11, %v976_v4 }
 0x317   : > { %514 = vst [vmem:[%s242_s29 + $0x20] sm:$0xff] %v506_v12  ;;  %515 = vst [vmem:[%s242_s29 + $0x28] sm:$0xff] %v507_v5 }
 0x318   : > { %v501_v0 = vpop.permute.xlu1 %500 }
 0x319   : > { %v508_v1 = vmul.f32 %v501_v0, %v984_v8  ;;  %v509_v2 = vmul.f32 %v501_v0, %v986_v9 }
 0x31b   : > { %516 = vst [vmem:[%s242_s29 + $0x30] sm:$0xff] %v508_v1  ;;  %517 = vst [vmem:[%s242_s29 + $0x38] sm:$0xff] %v509_v2 }
 0x31c   : > { %760 = shalt.err (!%p757_p2)
}
 0x31d   : > { %s761_s11 = scalar_lea.hbm %s1032_s16, 1024  ;;  %s765_s26 = scalar_lea.hbm %s1083_s5, 2048 }
 0x31e   : > { %p762_p4 = scmp.ne.s32.totalorder %s1032_s16, %s761_s11  ;;  %p766_p9 = scmp.lt.u32.totalorder %s1032_s16, %s1083_s5 }
 0x31f   : > { %p767_p1 = scmp.lt.u32.totalorder %s765_s26, %s761_s11  ;;  %p769_p6 = scmp.lt.u32.totalorder %s761_s11, %s1032_s16 }
 0x320   : > { %p763_p5 = pnand %p762_p4, %p1090_p11 }
 0x321   : > { %p768_p3 = por %p767_p1, %p766_p9 }
 0x322   : > { %p764_p7 = pneg %p763_p5 }
 0x323   : > { %p770_p12 = por %p769_p6, %p768_p3 }
 0x325   : > { %p771_p13 = pnand %p770_p12, %p764_p7 }
 0x327   : > { %774 = shalt.err (!%p771_p13)
}
 0x328   : > { %s822_s14 = smov 256   ;;  %s823_s25 = smov 16  }
 0x329   : > { %662 = dma.vmem_to_hbm [thread:$0]  (%p1090_p11), %s1027_s12, 1024, %s1032_s16, %s519_s22, %s822_s14, %s822_s14, %s823_s25  }
 0x32a PF: > { %s547_s15 = sand.u32 1, %s801_s18   ;;  %p1091_p8 = scmp.ne.s32.totalorder %s1088_s6, 0 }
 0x32b   : > { %p1092_p10 = scmp.ge.s32.totalorder %s813_s21, 2  ;;  %s548_s8 = scalar_lea.sflag [#allocation4], %s547_s15 }
 0x32d   : > { %p669_p0 = pnand %p1092_p10, %p1091_p8 }
 0x32f   : > { %796 = dma.done.wait (!%p669_p0), %s548_s8, 1024  }
 0x330   : > { %798 = vsyncadd (!%p669_p0), %s548_s8, 4294966272  ;;  %p18_p2 = scmp.ge.s32.totalorder %s879_s24, 4   ;;  %s1093_s18 = smov %s805_s19 }
 0x331   : > { %s1094_s19 = smov %s809_s20  ;;  %s1095_s20 = smov %s891_s27 }
 0x332   : > { %s1096_s21 = smov %s879_s24  ;;  %20 = sbr.rel (!%p18_p2) target bundleno = 5 (0x5), region = 85 }
 0x339   :  { %553 = vsyncpa [#allocation3], 1 }
 0x33a   :  { %555 = vsyncpa [#allocation3 + $0x1], 1 }
 0x33b   :  { %556 = vsyncpa [#allocation4], 1 }
 0x33c   :  { %558 = vsyncpa [#allocation4 + $0x1], 1 }

</bundles_post_ra>
